<compile_context>
chip_gen: v5e
topology: v5e:2x2
jax: 0.10.0
libtpu: 0.0.40
codegen_flags: <defaults>
</compile_context>

<pallas_src>
import math
import jax
import jax.numpy as jnp
from jax.experimental import pallas as pl
from jax.experimental.pallas import tpu as pltpu

LANE = 128
_ROW_ALIGN = 16  # bf16 packs 16 sublanes/tile; keep every slab piece tile-aligned


# ---------------------------------------------------------------------------
# Kernel factory: fused 6-matmul forward, all tiles lane-dense (128 wide).
# `layout` maps piece-name -> (row_offset, rows) inside the packed bf16 weight slab.
# ---------------------------------------------------------------------------
def _make_kernel(layout):
    def kernel(state_ref, w_ref, out_ref):
        def w(name):
            off, rows = layout[name]
            return w_ref[off:off + rows, :]          # static, 16-row-aligned slice

        def dense(x, wname, bname, relu):
            # bf16 operands, f32 accumulation (single-pass MXU).
            y = jnp.dot(x.astype(jnp.bfloat16), w(wname),
                        preferred_element_type=jnp.float32)
            y = y + w(bname).astype(jnp.float32)
            return jnp.maximum(y, 0.0) if relu else y

        x = state_ref[...]                           # (bt, S) f32

        # ---- rnd_model predictor: S -> H -> H -> S (padded to 128 lanes) ----
        h = dense(x, "rw1", "rb1", True)
        h = dense(h, "rw2", "rb2", True)
        pred = dense(h, "rw3", "rb3", False)         # pred in lanes 0..S-1, zeros elsewhere

        # ---- metacritic head: S -> mc0 -> mc1 -> 1 (scalar routed to lane S) ----
        m = dense(pred, "mw1", "mb1", True)
        m = dense(m, "mw2", "mb2", True)
        err = dense(m, "mw3", "mb3", False)          # err in lane S only, zeros elsewhere

        # Packed lane-dense output (pred | err), bf16 store halves the HBM write.
        out_ref[...] = (pred + err).astype(out_ref.dtype)

    return kernel


# ---------------------------------------------------------------------------
# Batch-tile selection: largest multiple-of-8 divisor of B <= target, and at
# least 2 grid steps whenever B >= 16 (v7x megacore).  Odd batches fall back to
# a single full-extent block (still legal: block == full array dim).
# ---------------------------------------------------------------------------
def _pick_batch_tile(B, target=4096):
    if B < 8 or B % 8 != 0:
        return B
    bt = min(B, target)
    bt -= bt % 8
    while B % bt:
        bt -= 8
    if B // bt < 2 and B >= 16:
        half = (bt // 2) - ((bt // 2) % 8)
        while half >= 8 and B % half:
            half -= 8
        if half >= 8:
            bt = half
    return bt


# ---------------------------------------------------------------------------
# Wrapper: tiles over batch; one resident packed bf16 weight slab, one 128-lane
# bf16 output.
# ---------------------------------------------------------------------------
def metacritic_rnd_forward(state, packed_w, layout, *, batch_tile=None,
                           out_dtype=jnp.bfloat16, return_packed=False):
    B, S = state.shape
    total_rows = layout["_total_rows"]

    bt = _pick_batch_tile(B) if batch_tile is None else batch_tile
    assert B % bt == 0, "batch_tile must divide the batch"

    kernel = _make_kernel(layout)
    out_bytes = jnp.dtype(out_dtype).itemsize

    # Advisory cost estimate (everything padded to 128-wide matmuls).
    flops = int(2 * B * (S * LANE + 5 * LANE * LANE))
    bytes_accessed = int(B * S * 4 + B * LANE * out_bytes + total_rows * LANE * 2)
    cost = pl.CostEstimate(flops=flops, transcendentals=0,
                           bytes_accessed=bytes_accessed)

    # VMEM budget: double-buffered state + output tiles + resident weight slab.
    vmem_need = (2 * bt * S * 4) + (2 * bt * LANE * out_bytes) + (2 * total_rows * LANE * 2)
    cp_kwargs = dict(dimension_semantics=("parallel",))
    if vmem_need > 12 * 1024 * 1024:      # only override when near v5e's 16 MiB default
        cp_kwargs["vmem_limit_bytes"] = int(min(2 * vmem_need, 60 * 1024 * 1024))

    def build(weight_pipeline_mode):
        if weight_pipeline_mode is not None:
            w_spec = pl.BlockSpec((total_rows, LANE), lambda i: (0, 0),
                                  pipeline_mode=weight_pipeline_mode)
        else:
            w_spec = pl.BlockSpec((total_rows, LANE), lambda i: (0, 0))
        return pl.pallas_call(
            kernel,
            out_shape=jax.ShapeDtypeStruct((B, LANE), out_dtype),
            grid_spec=pltpu.PrefetchScalarGridSpec(
                num_scalar_prefetch=0,
                grid=(B // bt,),
                in_specs=[
                    pl.BlockSpec((bt, S), lambda i: (i, 0)),   # state tile
                    w_spec,                                     # resident packed weights
                ],
                out_specs=pl.BlockSpec((bt, LANE), lambda i: (i, 0)),
            ),
            compiler_params=pltpu.CompilerParams(**cp_kwargs),
            cost_estimate=cost,
        )

    try:
        # Constant-index weight slab does not need a double buffer.
        packed_out = build(pl.Buffered(1))(state, packed_w)
    except Exception:
        # Fallback for JAX versions that reject a 1-deep pipeline on this operand.
        packed_out = build(None)(state, packed_w)

    if return_packed:
        return packed_out
    pred = packed_out[:, :S]
    err = packed_out[:, S:S + 1]
    return pred, err


# ---------------------------------------------------------------------------
# Pack the 12 weight/bias arrays into a single (rows, 128) bf16 slab.
# Zero-padding is arranged so plain 128-wide matmuls reproduce the exact math
# and the error estimate lands in lane S of the packed output.
# ---------------------------------------------------------------------------
def pack_params(params, state_dim):
    (rw1, rb1, rw2, rb2, rw3, rb3, mw1, mb1, mw2, mb2, mw3, mb3) = params
    S = state_dim
    H = rw1.shape[1]
    mc0, mc1 = mw1.shape[1], mw2.shape[1]
    # TODO(synk): support hidden dims > 128 (would need multi-tile lane packing).
    assert max(H, mc0, mc1, S + 1) <= LANE

    def padc(a):  # pad lane (last) dim with zeros up to LANE
        a = jnp.asarray(a, jnp.float32)
        return jnp.pad(a, ((0, 0), (0, LANE - a.shape[1])))

    z = lambda: jnp.zeros((LANE, LANE), jnp.float32)

    pieces = [
        ("rw1", padc(rw1)),                                     # (S,   128)
        ("rb1", padc(rb1)),                                     # (1,   128)
        ("rw2", z().at[:H, :H].set(rw2)),                       # (128, 128)
        ("rb2", padc(rb2)),
        ("rw3", z().at[:H, :S].set(rw3)),                       # pred -> lanes 0..S-1
        ("rb3", padc(rb3)),
        ("mw1", z().at[:S, :mc0].set(mw1)),
        ("mb1", padc(mb1)),
        ("mw2", z().at[:mc0, :mc1].set(mw2)),
        ("mb2", padc(mb2)),
        ("mw3", z().at[:mc1, S:S + 1].set(mw3)),                # err -> lane S
        ("mb3", jnp.zeros((1, LANE), jnp.float32).at[:, S:S + 1].set(mb3)),
    ]

    layout = {}
    rows = []
    off = 0
    for name, mat in pieces:
        r = mat.shape[0]
        r_alloc = -(-r // _ROW_ALIGN) * _ROW_ALIGN     # bf16 (16,128) tile alignment
        if r_alloc != r:
            mat = jnp.pad(mat, ((0, r_alloc - r), (0, 0)))
        layout[name] = (off, r)                        # rows the kernel actually reads
        rows.append(mat)
        off += r_alloc
    packed = jnp.concatenate(rows, axis=0).astype(jnp.bfloat16)
    layout["_total_rows"] = off
    return packed, layout


# ---------------------------------------------------------------------------
# Deterministic parameter init (orthogonal with gain sqrt(2), zero bias),
# mirroring nn.init.orthogonal_(weight, gain); layer.bias.data.zero_().
# ---------------------------------------------------------------------------
def _orthogonal(key, in_dim, out_dim, gain):
    n = max(in_dim, out_dim)
    a = jax.random.normal(key, (n, n), dtype=jnp.float32)
    q, r = jnp.linalg.qr(a)
    q = q * jnp.sign(jnp.diag(r))[None, :]
    return (gain * q[:in_dim, :out_dim]).astype(jnp.float32)    # stored [in, out]


def make_params(key, state_dim, rnd_hidden, mc_h):
    g = math.sqrt(2.0)
    ks = jax.random.split(key, 6)
    # rnd predictor MLP: state_dim -> H -> H -> state_dim
    rw1 = _orthogonal(ks[0], state_dim, rnd_hidden, g)
    rb1 = jnp.zeros((1, rnd_hidden), jnp.float32)
    rw2 = _orthogonal(ks[1], rnd_hidden, rnd_hidden, g)
    rb2 = jnp.zeros((1, rnd_hidden), jnp.float32)
    rw3 = _orthogonal(ks[2], rnd_hidden, state_dim, g)
    rb3 = jnp.zeros((1, state_dim), jnp.float32)
    # metacritic MLP: state_dim -> mc_h0 -> mc_h1 -> 1
    mw1 = _orthogonal(ks[3], state_dim, mc_h[0], g)
    mb1 = jnp.zeros((1, mc_h[0]), jnp.float32)
    mw2 = _orthogonal(ks[4], mc_h[0], mc_h[1], g)
    mb2 = jnp.zeros((1, mc_h[1]), jnp.float32)
    mw3 = _orthogonal(ks[5], mc_h[1], 1, g)
    mb3 = jnp.zeros((1, 1), jnp.float32)
    return (rw1, rb1, rw2, rb2, rw3, rb3, mw1, mb1, mw2, mb2, mw3, mb3)


# ---------------------------------------------------------------------------
# Pure-JAX reference.  matmul_dtype=jnp.bfloat16 matches the kernel's intentional
# numerics (bf16 operands, f32 accumulation).
# ---------------------------------------------------------------------------
def _reference(state, params, *, matmul_dtype=jnp.float32):
    (rw1, rb1, rw2, rb2, rw3, rb3, mw1, mb1, mw2, mb2, mw3, mb3) = params

    def dense(x, w_, b_, relu):
        y = jnp.dot(x.astype(matmul_dtype), w_.astype(matmul_dtype),
                    preferred_element_type=jnp.float32) + b_.astype(jnp.float32)
        return jax.nn.relu(y) if relu else y

    h = dense(state, rw1, rb1, True)
    h = dense(h, rw2, rb2, True)
    pred = dense(h, rw3, rb3, False)
    m = dense(pred, mw1, mb1, True)
    m = dense(m, mw2, mb2, True)
    err = dense(m, mw3, mb3, False)
    return pred, err


if __name__ == "__main__":
    # Small Bullet-like sizes: vector state, two hidden layers per MLP.
    # B=64 exercises batch tiling (2 grid steps -> both v7x TensorCores get work).
    B, STATE_DIM, RND_H = 64, 16, 64
    MC_H = (64, 32)          # corresponds to config.mc_h = "64,32"

    key = jax.random.PRNGKey(0)
    k_state, k_params = jax.random.split(key)
    state = jax.random.normal(k_state, (B, STATE_DIM), dtype=jnp.float32)
    params = make_params(k_params, STATE_DIM, RND_H, MC_H)
    packed_w, layout = pack_params(params, STATE_DIM)

    pred, err = metacritic_rnd_forward(state, packed_w, layout)
    jax.block_until_ready((pred, err))

    assert pred.shape == (B, STATE_DIM) and err.shape == (B, 1)

    # Compare against a reference with matched bf16-matmul / f32-accumulate numerics.
    pred_ref, err_ref = _reference(state, params, matmul_dtype=jnp.bfloat16)
    pred_f32 = pred.astype(jnp.float32)
    err_f32 = err.astype(jnp.float32)
    assert jnp.allclose(pred_f32, pred_ref, atol=1e-2, rtol=1e-2), \
        float(jnp.max(jnp.abs(pred_f32 - pred_ref)))
    assert jnp.allclose(err_f32, err_ref, atol=1e-2, rtol=1e-2), \
        float(jnp.max(jnp.abs(err_f32 - err_ref)))

    print("KERNEL_OK")
</pallas_src>

<mosaic_0001>
module attributes {stable_mosaic.version = 11 : i64} {
  func.func @kernel(%arg0: i32, %arg1: memref<32x16xf32, #tpu.memory_space<vmem>>, %arg2: memref<752x128xbf16, #tpu.memory_space<vmem>>, %arg3: memref<32x128xbf16, #tpu.memory_space<vmem>>) attributes {dimension_semantics = [#tpu.dimension_semantics<parallel>], iteration_bounds = array<i64: 2>, scalar_prefetch = 0 : i64, scratch_operands = 0 : i64, tpu.core_type = #tpu.core_type<tc>, window_params = [{transform_indices = @transform_0, window_bounds = array<i64: 32, 16>}, {pipeline_mode = #tpu.pipeline_mode<synchronous>, transform_indices = @transform_1, window_bounds = array<i64: 752, 128>}, {transform_indices = @transform_2, window_bounds = array<i64: 32, 128>}]} {
    %c0 = arith.constant 0 : index
    %c0_0 = arith.constant 0 : index
    %0 = vector.load %arg1[%c0, %c0_0] : memref<32x16xf32, #tpu.memory_space<vmem>>, vector<32x16xf32>
    %1 = arith.truncf %0 : vector<32x16xf32> to vector<32x16xbf16>
    %c0_1 = arith.constant 0 : index
    %c0_2 = arith.constant 0 : index
    %2 = vector.load %arg2[%c0_1, %c0_2] : memref<752x128xbf16, #tpu.memory_space<vmem>>, vector<16x128xbf16>
    %cst = arith.constant dense<0.000000e+00> : vector<32x128xf32>
    %3 = tpu.matmul %1, %2, %cst {dimension_numbers = #tpu.dot_dimension_numbers<[1], [0], [0], [1], [0, 0, 1, 1], [], []>} : vector<32x16xbf16>, vector<16x128xbf16>, vector<32x128xf32> -> vector<32x128xf32>
    %c16 = arith.constant 16 : index
    %c0_3 = arith.constant 0 : index
    %4 = vector.load %arg2[%c16, %c0_3] : memref<752x128xbf16, #tpu.memory_space<vmem>>, vector<1x128xbf16>
    %5 = arith.extf %4 : vector<1x128xbf16> to vector<1x128xf32>
    %6 = vector.broadcast %5 : vector<1x128xf32> to vector<32x128xf32>
    %7 = arith.addf %3, %6 : vector<32x128xf32>
    %cst_4 = arith.constant 0.000000e+00 : f32
    %8 = vector.broadcast %cst_4 : f32 to vector<32x128xf32>
    %9 = arith.maximumf %7, %8 : vector<32x128xf32>
    %10 = arith.truncf %9 : vector<32x128xf32> to vector<32x128xbf16>
    %c32 = arith.constant 32 : index
    %c0_5 = arith.constant 0 : index
    %11 = vector.load %arg2[%c32, %c0_5] : memref<752x128xbf16, #tpu.memory_space<vmem>>, vector<128x128xbf16>
    %cst_6 = arith.constant dense<0.000000e+00> : vector<32x128xf32>
    %12 = tpu.matmul %10, %11, %cst_6 {dimension_numbers = #tpu.dot_dimension_numbers<[1], [0], [0], [1], [0, 0, 1, 1], [], []>} : vector<32x128xbf16>, vector<128x128xbf16>, vector<32x128xf32> -> vector<32x128xf32>
    %c160 = arith.constant 160 : index
    %c0_7 = arith.constant 0 : index
    %13 = vector.load %arg2[%c160, %c0_7] : memref<752x128xbf16, #tpu.memory_space<vmem>>, vector<1x128xbf16>
    %14 = arith.extf %13 : vector<1x128xbf16> to vector<1x128xf32>
    %15 = vector.broadcast %14 : vector<1x128xf32> to vector<32x128xf32>
    %16 = arith.addf %12, %15 : vector<32x128xf32>
    %cst_8 = arith.constant 0.000000e+00 : f32
    %17 = vector.broadcast %cst_8 : f32 to vector<32x128xf32>
    %18 = arith.maximumf %16, %17 : vector<32x128xf32>
    %19 = arith.truncf %18 : vector<32x128xf32> to vector<32x128xbf16>
    %c176 = arith.constant 176 : index
    %c0_9 = arith.constant 0 : index
    %20 = vector.load %arg2[%c176, %c0_9] : memref<752x128xbf16, #tpu.memory_space<vmem>>, vector<128x128xbf16>
    %cst_10 = arith.constant dense<0.000000e+00> : vector<32x128xf32>
    %21 = tpu.matmul %19, %20, %cst_10 {dimension_numbers = #tpu.dot_dimension_numbers<[1], [0], [0], [1], [0, 0, 1, 1], [], []>} : vector<32x128xbf16>, vector<128x128xbf16>, vector<32x128xf32> -> vector<32x128xf32>
    %c304 = arith.constant 304 : index
    %c0_11 = arith.constant 0 : index
    %22 = vector.load %arg2[%c304, %c0_11] : memref<752x128xbf16, #tpu.memory_space<vmem>>, vector<1x128xbf16>
    %23 = arith.extf %22 : vector<1x128xbf16> to vector<1x128xf32>
    %24 = vector.broadcast %23 : vector<1x128xf32> to vector<32x128xf32>
    %25 = arith.addf %21, %24 : vector<32x128xf32>
    %26 = arith.truncf %25 : vector<32x128xf32> to vector<32x128xbf16>
    %c320 = arith.constant 320 : index
    %c0_12 = arith.constant 0 : index
    %27 = vector.load %arg2[%c320, %c0_12] : memref<752x128xbf16, #tpu.memory_space<vmem>>, vector<128x128xbf16>
    %cst_13 = arith.constant dense<0.000000e+00> : vector<32x128xf32>
    %28 = tpu.matmul %26, %27, %cst_13 {dimension_numbers = #tpu.dot_dimension_numbers<[1], [0], [0], [1], [0, 0, 1, 1], [], []>} : vector<32x128xbf16>, vector<128x128xbf16>, vector<32x128xf32> -> vector<32x128xf32>
    %c448 = arith.constant 448 : index
    %c0_14 = arith.constant 0 : index
    %29 = vector.load %arg2[%c448, %c0_14] : memref<752x128xbf16, #tpu.memory_space<vmem>>, vector<1x128xbf16>
    %30 = arith.extf %29 : vector<1x128xbf16> to vector<1x128xf32>
    %31 = vector.broadcast %30 : vector<1x128xf32> to vector<32x128xf32>
    %32 = arith.addf %28, %31 : vector<32x128xf32>
    %cst_15 = arith.constant 0.000000e+00 : f32
    %33 = vector.broadcast %cst_15 : f32 to vector<32x128xf32>
    %34 = arith.maximumf %32, %33 : vector<32x128xf32>
    %35 = arith.truncf %34 : vector<32x128xf32> to vector<32x128xbf16>
    %c464 = arith.constant 464 : index
    %c0_16 = arith.constant 0 : index
    %36 = vector.load %arg2[%c464, %c0_16] : memref<752x128xbf16, #tpu.memory_space<vmem>>, vector<128x128xbf16>
    %cst_17 = arith.constant dense<0.000000e+00> : vector<32x128xf32>
    %37 = tpu.matmul %35, %36, %cst_17 {dimension_numbers = #tpu.dot_dimension_numbers<[1], [0], [0], [1], [0, 0, 1, 1], [], []>} : vector<32x128xbf16>, vector<128x128xbf16>, vector<32x128xf32> -> vector<32x128xf32>
    %c592 = arith.constant 592 : index
    %c0_18 = arith.constant 0 : index
    %38 = vector.load %arg2[%c592, %c0_18] : memref<752x128xbf16, #tpu.memory_space<vmem>>, vector<1x128xbf16>
    %39 = arith.extf %38 : vector<1x128xbf16> to vector<1x128xf32>
    %40 = vector.broadcast %39 : vector<1x128xf32> to vector<32x128xf32>
    %41 = arith.addf %37, %40 : vector<32x128xf32>
    %cst_19 = arith.constant 0.000000e+00 : f32
    %42 = vector.broadcast %cst_19 : f32 to vector<32x128xf32>
    %43 = arith.maximumf %41, %42 : vector<32x128xf32>
    %44 = arith.truncf %43 : vector<32x128xf32> to vector<32x128xbf16>
    %c608 = arith.constant 608 : index
    %c0_20 = arith.constant 0 : index
    %45 = vector.load %arg2[%c608, %c0_20] : memref<752x128xbf16, #tpu.memory_space<vmem>>, vector<128x128xbf16>
    %cst_21 = arith.constant dense<0.000000e+00> : vector<32x128xf32>
    %46 = tpu.matmul %44, %45, %cst_21 {dimension_numbers = #tpu.dot_dimension_numbers<[1], [0], [0], [1], [0, 0, 1, 1], [], []>} : vector<32x128xbf16>, vector<128x128xbf16>, vector<32x128xf32> -> vector<32x128xf32>
    %c736 = arith.constant 736 : index
    %c0_22 = arith.constant 0 : index
    %47 = vector.load %arg2[%c736, %c0_22] : memref<752x128xbf16, #tpu.memory_space<vmem>>, vector<1x128xbf16>
    %48 = arith.extf %47 : vector<1x128xbf16> to vector<1x128xf32>
    %49 = vector.broadcast %48 : vector<1x128xf32> to vector<32x128xf32>
    %50 = arith.addf %46, %49 : vector<32x128xf32>
    %51 = arith.addf %25, %50 : vector<32x128xf32>
    %52 = arith.truncf %51 : vector<32x128xf32> to vector<32x128xbf16>
    %c0_23 = arith.constant 0 : index
    %c0_24 = arith.constant 0 : index
    %53 = vector.load %arg3[%c0_23, %c0_24] : memref<32x128xbf16, #tpu.memory_space<vmem>>, vector<32x128xbf16>
    tpu.vector_store %arg3[%c0_23, %c0_24], %52 {strides = array<i32>} : memref<32x128xbf16, #tpu.memory_space<vmem>>, vector<32x128xbf16>,
    return
  }
  func.func @transform_0(%arg0: i32) -> (i32, i32) {
    %c0_i32 = arith.constant 0 : i32
    %c0_i32_0 = arith.constant 0 : i32
    return %arg0, %c0_i32 : i32, i32
  }
  func.func @transform_1(%arg0: i32) -> (i32, i32) {
    %c0_i32 = arith.constant 0 : i32
    %c0_i32_0 = arith.constant 0 : i32
    %c0_i32_1 = arith.constant 0 : i32
    return %c0_i32, %c0_i32_0 : i32, i32
  }
  func.func @transform_2(%arg0: i32) -> (i32, i32) {
    %c0_i32 = arith.constant 0 : i32
    %c0_i32_0 = arith.constant 0 : i32
    return %arg0, %c0_i32 : i32, i32
  }
}

module attributes {stable_mosaic.version = 11 : i64} {
  func.func @kernel(%arg0: i32, %arg1: memref<32x16xf32, #tpu.memory_space<vmem>>, %arg2: memref<752x128xbf16, #tpu.memory_space<vmem>>, %arg3: memref<32x128xbf16, #tpu.memory_space<vmem>>) attributes {dimension_semantics = [#tpu.dimension_semantics<parallel>], iteration_bounds = array<i64: 2>, scalar_prefetch = 0 : i64, scratch_operands = 0 : i64, tpu.core_type = #tpu.core_type<tc>, window_params = [{transform_indices = @transform_0, window_bounds = array<i64: 32, 16>}, {pipeline_mode = #tpu.pipeline_mode<synchronous>, transform_indices = @transform_1, window_bounds = array<i64: 752, 128>}, {transform_indices = @transform_2, window_bounds = array<i64: 32, 128>}]} {
    %c0 = arith.constant 0 : index
    %c0_0 = arith.constant 0 : index
    %0 = vector.load %arg1[%c0, %c0_0] : memref<32x16xf32, #tpu.memory_space<vmem>>, vector<32x16xf32>
    %1 = arith.truncf %0 : vector<32x16xf32> to vector<32x16xbf16>
    %c0_1 = arith.constant 0 : index
    %c0_2 = arith.constant 0 : index
    %2 = vector.load %arg2[%c0_1, %c0_2] : memref<752x128xbf16, #tpu.memory_space<vmem>>, vector<16x128xbf16>
    %cst = arith.constant dense<0.000000e+00> : vector<32x128xf32>
    %3 = tpu.matmul %1, %2, %cst {dimension_numbers = #tpu.dot_dimension_numbers<[1], [0], [0], [1], [0, 0, 1, 1], [], []>} : vector<32x16xbf16>, vector<16x128xbf16>, vector<32x128xf32> -> vector<32x128xf32>
    %c16 = arith.constant 16 : index
    %c0_3 = arith.constant 0 : index
    %4 = vector.load %arg2[%c16, %c0_3] : memref<752x128xbf16, #tpu.memory_space<vmem>>, vector<1x128xbf16>
    %5 = arith.extf %4 : vector<1x128xbf16> to vector<1x128xf32>
    %6 = vector.broadcast %5 : vector<1x128xf32> to vector<32x128xf32>
    %7 = arith.addf %3, %6 : vector<32x128xf32>
    %cst_4 = arith.constant 0.000000e+00 : f32
    %8 = vector.broadcast %cst_4 : f32 to vector<32x128xf32>
    %9 = arith.maximumf %7, %8 : vector<32x128xf32>
    %10 = arith.truncf %9 : vector<32x128xf32> to vector<32x128xbf16>
    %c32 = arith.constant 32 : index
    %c0_5 = arith.constant 0 : index
    %11 = vector.load %arg2[%c32, %c0_5] : memref<752x128xbf16, #tpu.memory_space<vmem>>, vector<128x128xbf16>
    %cst_6 = arith.constant dense<0.000000e+00> : vector<32x128xf32>
    %12 = tpu.matmul %10, %11, %cst_6 {dimension_numbers = #tpu.dot_dimension_numbers<[1], [0], [0], [1], [0, 0, 1, 1], [], []>} : vector<32x128xbf16>, vector<128x128xbf16>, vector<32x128xf32> -> vector<32x128xf32>
    %c160 = arith.constant 160 : index
    %c0_7 = arith.constant 0 : index
    %13 = vector.load %arg2[%c160, %c0_7] : memref<752x128xbf16, #tpu.memory_space<vmem>>, vector<1x128xbf16>
    %14 = arith.extf %13 : vector<1x128xbf16> to vector<1x128xf32>
    %15 = vector.broadcast %14 : vector<1x128xf32> to vector<32x128xf32>
    %16 = arith.addf %12, %15 : vector<32x128xf32>
    %cst_8 = arith.constant 0.000000e+00 : f32
    %17 = vector.broadcast %cst_8 : f32 to vector<32x128xf32>
    %18 = arith.maximumf %16, %17 : vector<32x128xf32>
    %19 = arith.truncf %18 : vector<32x128xf32> to vector<32x128xbf16>
    %c176 = arith.constant 176 : index
    %c0_9 = arith.constant 0 : index
    %20 = vector.load %arg2[%c176, %c0_9] : memref<752x128xbf16, #tpu.memory_space<vmem>>, vector<128x128xbf16>
    %cst_10 = arith.constant dense<0.000000e+00> : vector<32x128xf32>
    %21 = tpu.matmul %19, %20, %cst_10 {dimension_numbers = #tpu.dot_dimension_numbers<[1], [0], [0], [1], [0, 0, 1, 1], [], []>} : vector<32x128xbf16>, vector<128x128xbf16>, vector<32x128xf32> -> vector<32x128xf32>
    %c304 = arith.constant 304 : index
    %c0_11 = arith.constant 0 : index
    %22 = vector.load %arg2[%c304, %c0_11] : memref<752x128xbf16, #tpu.memory_space<vmem>>, vector<1x128xbf16>
    %23 = arith.extf %22 : vector<1x128xbf16> to vector<1x128xf32>
    %24 = vector.broadcast %23 : vector<1x128xf32> to vector<32x128xf32>
    %25 = arith.addf %21, %24 : vector<32x128xf32>
    %26 = arith.truncf %25 : vector<32x128xf32> to vector<32x128xbf16>
    %c320 = arith.constant 320 : index
    %c0_12 = arith.constant 0 : index
    %27 = vector.load %arg2[%c320, %c0_12] : memref<752x128xbf16, #tpu.memory_space<vmem>>, vector<128x128xbf16>
    %cst_13 = arith.constant dense<0.000000e+00> : vector<32x128xf32>
    %28 = tpu.matmul %26, %27, %cst_13 {dimension_numbers = #tpu.dot_dimension_numbers<[1], [0], [0], [1], [0, 0, 1, 1], [], []>} : vector<32x128xbf16>, vector<128x128xbf16>, vector<32x128xf32> -> vector<32x128xf32>
    %c448 = arith.constant 448 : index
    %c0_14 = arith.constant 0 : index
    %29 = vector.load %arg2[%c448, %c0_14] : memref<752x128xbf16, #tpu.memory_space<vmem>>, vector<1x128xbf16>
    %30 = arith.extf %29 : vector<1x128xbf16> to vector<1x128xf32>
    %31 = vector.broadcast %30 : vector<1x128xf32> to vector<32x128xf32>
    %32 = arith.addf %28, %31 : vector<32x128xf32>
    %cst_15 = arith.constant 0.000000e+00 : f32
    %33 = vector.broadcast %cst_15 : f32 to vector<32x128xf32>
    %34 = arith.maximumf %32, %33 : vector<32x128xf32>
    %35 = arith.truncf %34 : vector<32x128xf32> to vector<32x128xbf16>
    %c464 = arith.constant 464 : index
    %c0_16 = arith.constant 0 : index
    %36 = vector.load %arg2[%c464, %c0_16] : memref<752x128xbf16, #tpu.memory_space<vmem>>, vector<128x128xbf16>
    %cst_17 = arith.constant dense<0.000000e+00> : vector<32x128xf32>
    %37 = tpu.matmul %35, %36, %cst_17 {dimension_numbers = #tpu.dot_dimension_numbers<[1], [0], [0], [1], [0, 0, 1, 1], [], []>} : vector<32x128xbf16>, vector<128x128xbf16>, vector<32x128xf32> -> vector<32x128xf32>
    %c592 = arith.constant 592 : index
    %c0_18 = arith.constant 0 : index
    %38 = vector.load %arg2[%c592, %c0_18] : memref<752x128xbf16, #tpu.memory_space<vmem>>, vector<1x128xbf16>
    %39 = arith.extf %38 : vector<1x128xbf16> to vector<1x128xf32>
    %40 = vector.broadcast %39 : vector<1x128xf32> to vector<32x128xf32>
    %41 = arith.addf %37, %40 : vector<32x128xf32>
    %cst_19 = arith.constant 0.000000e+00 : f32
    %42 = vector.broadcast %cst_19 : f32 to vector<32x128xf32>
    %43 = arith.maximumf %41, %42 : vector<32x128xf32>
    %44 = arith.truncf %43 : vector<32x128xf32> to vector<32x128xbf16>
    %c608 = arith.constant 608 : index
    %c0_20 = arith.constant 0 : index
    %45 = vector.load %arg2[%c608, %c0_20] : memref<752x128xbf16, #tpu.memory_space<vmem>>, vector<128x128xbf16>
    %cst_21 = arith.constant dense<0.000000e+00> : vector<32x128xf32>
    %46 = tpu.matmul %44, %45, %cst_21 {dimension_numbers = #tpu.dot_dimension_numbers<[1], [0], [0], [1], [0, 0, 1, 1], [], []>} : vector<32x128xbf16>, vector<128x128xbf16>, vector<32x128xf32> -> vector<32x128xf32>
    %c736 = arith.constant 736 : index
    %c0_22 = arith.constant 0 : index
    %47 = vector.load %arg2[%c736, %c0_22] : memref<752x128xbf16, #tpu.memory_space<vmem>>, vector<1x128xbf16>
    %48 = arith.extf %47 : vector<1x128xbf16> to vector<1x128xf32>
    %49 = vector.broadcast %48 : vector<1x128xf32> to vector<32x128xf32>
    %50 = arith.addf %46, %49 : vector<32x128xf32>
    %51 = arith.addf %25, %50 : vector<32x128xf32>
    %52 = arith.truncf %51 : vector<32x128xf32> to vector<32x128xbf16>
    %c0_23 = arith.constant 0 : index
    %c0_24 = arith.constant 0 : index
    %53 = vector.load %arg3[%c0_23, %c0_24] : memref<32x128xbf16, #tpu.memory_space<vmem>>, vector<32x128xbf16>
    tpu.vector_store %arg3[%c0_23, %c0_24], %52 {strides = array<i32>} : memref<32x128xbf16, #tpu.memory_space<vmem>>, vector<32x128xbf16>,
    return
  }
  func.func @transform_0(%arg0: i32) -> (i32, i32) {
    %c0_i32 = arith.constant 0 : i32
    %c0_i32_0 = arith.constant 0 : i32
    return %arg0, %c0_i32 : i32, i32
  }
  func.func @transform_1(%arg0: i32) -> (i32, i32) {
    %c0_i32 = arith.constant 0 : i32
    %c0_i32_0 = arith.constant 0 : i32
    %c0_i32_1 = arith.constant 0 : i32
    return %c0_i32, %c0_i32_0 : i32, i32
  }
  func.func @transform_2(%arg0: i32) -> (i32, i32) {
    %c0_i32 = arith.constant 0 : i32
    %c0_i32_0 = arith.constant 0 : i32
    return %arg0, %c0_i32 : i32, i32
  }
}

</mosaic_0001>

<bundles_post_ra>
// kernel: tpu_custom_call.1
= control target key start
LH: loop header
LB: loop body
LE: loop exit
PB: predicated region body
PF: predicated region fallthrough
CT: control target
= control target key end

     0   :  { %7 = vsyncpa [#allocation3], 0  ;;  %s1287_s0 = inlined_call_operand.vmem [shape: f32[64,16], index: 0, kind: input, shape index: {}]   ;;  %s1288_s1 = inlined_call_operand.hbm [shape: bf16[752,128], index: 1, kind: input, shape index: {}]   ;;  %s1289_s2 = inlined_call_operand.hbm [shape: bf16[64,128], index: 2, kind: output, shape index: {}]  }
   0x1   :  { %8 = vsyncpa [#allocation4], 0 }
   0x2   :  { %10 = vsyncpa [#allocation4 + $0x1], 0  ;;  %s1177_s9 = smov 0   ;;  %s1179_s10 = smov 0  }
   0x3   :  { %s1181_s11 = smov 0   ;;  %s1183_s12 = smov 0  }
   0x4 LB: > { %s1198_s13 = sadd.s32 4294967295, %s1155_s12   ;;  %s764_s14 = sadd.s32 4294967294, %s1155_s12   ;;  %s1155_s12 = sphi %s1183_s12, %s1295_s12   ;;  %s1151_s11 = sphi %s1181_s11, %s1294_s11   ;;  %s1147_s10 = sphi %s1179_s10, %s1293_s10   ;;  %s1143_s9 = sphi %s1177_s9, %s1292_s9  }
   0x5   : > { %s1202_s15 = sadd.s32 1, %s1155_s12   ;;  %s70_s16 = sadd.s32 1, %s1151_s11 }
   0x6   : > { %s67_s17 = ssub.s32 %s1155_s12, %s1202_s15  ;;  %p80_p0 = scmp.ne.s32.totalorder %s1151_s11, %s1147_s10 }
   0x7   : > { %p68_p1 = scmp.eq.s32.totalorder %s67_s17, 0  ;;  %p81_p2 = scmp.eq.s32.totalorder %s1198_s13, 1 }
   0x8   : > { %p86_p3 = scmp.ne.s32.totalorder %s1147_s10, %s1143_s9  ;;  %p87_p4 = scmp.eq.s32.totalorder %s764_s14, 1 }
   0x9   : > { %s1213_s18 = scalar_select %p68_p1, %s1151_s11, %s70_s16  }
   0xa   : > { %p1215_p5 = por %p81_p2, %p80_p0  ;;  %p1219_p6 = por %p87_p4, %p86_p3 }
   0xb   : > { %p765_p7 = scmp.ge.s32.totalorder %s1155_s12, 1  ;;  %p94_p8 = scmp.lt.s32.totalorder %s1155_s12, 3 }
   0xc   : > { %p1019_p9 = scmp.eq.s32.totalorder %s1198_s13, 0  ;;  %s105_s23 = sshll.u32 %s1288_s1, 4  ;;  %s106_s23 = int_to_ptr.hbm [resolvable:$true] %s105_s23 }
   0xd   : > { %p95_p10 = pnand %p765_p7, %p94_p8  ;;  %s1157_s24 = smov [#allocation2]  }
   0xe   : > { %s107_s25 = sshll.u32 %s1157_s24, 4  ;;  %s1158_s26 = smov 64   ;;  %s108_s25 = int_to_ptr.vmem [resolvable:$true] %s107_s25 }
   0xf   : > { %p1011_p11 = pneg %p95_p10  ;;  %s1159_s27 = smov 4  }
  0x10   : > { %132 = sbr.rel (%p95_p10) target bundleno = 907 (0x38b), region = 28 }
  0x11   : > { %p1012_p12 = pnand %p1019_p9, %p1011_p11 }
  0x13   : > { %1014 = dma.hbm_to_vmem [thread:$0]  (!%p1012_p12), %s106_s23, 6016, %s108_s25, [#allocation3], %s1158_s26, %s1158_s26, %s1159_s27  }
  0x15   : > { %1134 = dma.done.wait (%p1019_p9), [#allocation3], 6016  }
  0x16   : > { %1136 = vsyncadd (%p1019_p9), [#allocation3], 4294961280  ;;  %s771_s28 = sshll.u32 %s1198_s13, 2  ;;  %v944_v0 = vld [vmem:[#allocation2] sm:$0xff]  ;;  %v952_v4 = vld [vmem:[#allocation2 + $0x48] sm:$0xff]  ;;  %vm180_vm0 = vcmask 130048  }
  0x17   : > { %p156_p13 = scmp.lt.s32.totalorder %s771_s28, 7  ;;  %194 = vmatpush.bf16.msra.mxu0 %v944_v0  ;;  %279 = vmatpush.bf16.msra.mxu1 %v952_v4  ;;  %v951_v5 = vld [vmem:[#allocation2 + $0x40] sm:$0xff]  ;;  %v950_v6 = vld [vmem:[#allocation2 + $0x38] sm:$0xff]  ;;  %v949_v7 = vld [vmem:[#allocation2 + $0x30] sm:$0xff]  ;;  %s152_s5 = sand.u32 1, %s1147_s10  }
  0x18   : > { %v948_v11 = vld [vmem:[#allocation2 + $0x28] sm:$0xff]  ;;  %v947_v12 = vld [vmem:[#allocation2 + $0x20] sm:$0xff]  ;;  %v946_v13 = vld [vmem:[#allocation2 + $0x18] sm:$0xff]  ;;  %s770_s6 = sshll.u32 %s152_s5, 4  ;;  %s985_s8 = sshll.u32 %s1198_s13, 4 }
  0x19   : > { %s1297_s28 = smov (!%p156_p13, %s771_s28), 7  ;;  %v945_v14 = vld [vmem:[#allocation2 + $0x10] sm:$0xff]  ;;  %v171_v15 = vld [vmem:[#allocation2 + $0x8] sm:$0x1]  ;;  %v958_v21 = vld [vmem:[#allocation2 + $0x80] sm:$0xff]  ;;  %s154_s7 = scalar_lea.vmem [#allocation5], %s770_s6 }
  0x1a   : > { %s772_s29 = sshll.u32 %s1297_s28, 3  ;;  %v172_v16 = vunpack.c.l.bf16 %v171_v15  ;;  %v960_v17 = vld [vmem:[#allocation2 + $0x90] sm:$0xff]  ;;  %v959_v19 = vld [vmem:[#allocation2 + $0x88] sm:$0xff]  ;;  %v957_v25 = vld [vmem:[#allocation2 + $0x78] sm:$0xff]  ;;  %s686_s17 = scalar_lea.hbm %s1289_s2, %s985_s8 }
  0x1b   : > { %s159_s4 = scalar_lea.vmem %s1287_s0, %s772_s29  ;;  %280 = vmatpush.bf16.msra.mxu1 %v951_v5  ;;  %371 = vmatpush.bf16.msra.mxu2 %v960_v17  ;;  %v956_v36 = vld [vmem:[#allocation2 + $0x70] sm:$0xff]  ;;  %v955_v37 = vld [vmem:[#allocation2 + $0x68] sm:$0xff]  ;;  %v954_v38 = vld [vmem:[#allocation2 + $0x60] sm:$0xff]  ;;  %s687_s21 = sshll.u32 %s154_s7, 4  ;;  %s688_s21 = int_to_ptr.vmem [resolvable:$true] %s687_s21 }
  0x1c   : > { %v163_v1 = vld [vmem:[%s159_s4] sm:$0xff]  ;;  %v164_v2 = vld [vmem:[%s159_s4 + $0x8] sm:$0xff]  ;;  %v165_v8 = vld [vmem:[%s159_s4 + $0x10] sm:$0xff]  ;;  %v173_v20 = vperm.slane %v172_v16, 0  ;;  %s689_s22 = sshll.u32 %s686_s17, 4  ;;  %s675_s23 = scalar_lea.sflag [#allocation4], %s152_s5  ;;  %s690_s22 = int_to_ptr.hbm [resolvable:$true] %s689_s22 }
  0x1d   : > { %v167_v3 = vpack.c.bf16 %v164_v2, %v163_v1  ;;  %v166_v9 = vld [vmem:[%s159_s4 + $0x18] sm:$0xff]  ;;  %v228_v40 = vld [vmem:[#allocation2 + $0x50] sm:$0x1]  ;;  %v966_v46 = vld [vmem:[#allocation2 + $0xc8] sm:$0xff]  ;;  %s1103_s13 = sshra.s32 %s690_s22, 4  ;;  %s1109_s27 = scalar_lea.hbm %s1289_s2, 32  ;;  %s1104_s13 = int_to_ptr.hbm [resolvable:$true] %s1103_s13 }
  0x1e   : > { %v168_v10 = vpack.c.bf16 %v166_v9, %v165_v8  ;;  %v953_v39 = vld [vmem:[#allocation2 + $0x58] sm:$0xff]  ;;  %v229_v41 = vunpack.c.l.bf16 %v228_v40  ;;  %v967_v44 = vld [vmem:[#allocation2 + $0xd0] sm:$0xff]  ;;  %v965_v50 = vld [vmem:[#allocation2 + $0xc0] sm:$0xff]  ;;  %s1105_s24 = scalar_lea.hbm %s1104_s13, 16  ;;  %p1110_p3 = scmp.lt.s32.totalorder %s1104_s13, %s1289_s2 }
  0x1f   : > { %777 = vmatmul.msk.bf16.vlgmr.msra.gmra.mxu0 %vm180_vm0, %v167_v3  ;;  %281 = vmatpush.bf16.msra.mxu1 %v950_v6  ;;  %v968_v42 = vld [vmem:[#allocation2 + $0xd8] sm:$0xff]  ;;  %v963_v62 = vld [vmem:[#allocation2 + $0xb0] sm:$0xff]  ;;  %v962_v63 = vld [vmem:[#allocation2 + $0xa8] sm:$0xff]  ;;  %p1106_p0 = scmp.ne.s32.totalorder %s1104_s13, %s1105_s24  ;;  %p1111_p4 = scmp.lt.s32.totalorder %s1109_s27, %s1105_s24 }
  0x20   : > { %372 = vmatpush.bf16.msra.mxu2 %v959_v19  ;;  %459 = vmatpush.bf16.msra.mxu3 %v968_v42  ;;  %v230_v45 = vperm.slane %v229_v41, 0  ;;  %v964_v54 = vld [vmem:[#allocation2 + $0xb8] sm:$0xff]  ;;  %v961_v0 = vld [vmem:[#allocation2 + $0xa0] sm:$0xff]  ;;  %v974_v6 = vld [vmem:[#allocation2 + $0x110] sm:$0xff] }
  0x21   : > { %v976_v1 = vld [vmem:[#allocation2 + $0x120] sm:$0xff]  ;;  %v320_v2 = vld [vmem:[#allocation2 + $0x98] sm:$0x1]  ;;  %v973_v8 = vld [vmem:[#allocation2 + $0x108] sm:$0xff]  ;;  %p1107_p1 = pnand %p1106_p0, %p1215_p5  ;;  %p1112_p7 = por %p1111_p4, %p1110_p3 }
  0x22   : > { %551 = vmatpush.bf16.msrb.mxu0 %v976_v1  ;;  %v975_v3 = vld [vmem:[#allocation2 + $0x118] sm:$0xff]  ;;  %v321_v5 = vunpack.c.l.bf16 %v320_v2 }
  0x23   : > { %282 = vmatpush.bf16.msra.mxu1 %v949_v7  ;;  %v971_v19 = vld [vmem:[#allocation2 + $0xf8] sm:$0xff]  ;;  %p1108_p2 = pneg %p1107_p1 }
  0x24   : > { %373 = vmatpush.bf16.msra.mxu2 %v958_v21  ;;  %460 = vmatpush.bf16.msra.mxu3 %v967_v44  ;;  %v322_v7 = vperm.slane %v321_v5, 0  ;;  %v969_v21 = vld [vmem:[#allocation2 + $0xe8] sm:$0xff]  ;;  %v979_v44 = vld [vmem:[#allocation2 + $0x140] sm:$0xff] }
  0x25   : > { %p1113_p8 = pnand %p1112_p7, %p1108_p2 }
  0x26   : > { %552 = vmatpush.bf16.msrb.mxu0 %v975_v3 }
  0x27   : > { %283 = vmatpush.bf16.msra.mxu1 %v948_v11 }
  0x28   : > { %374 = vmatpush.bf16.msra.mxu2 %v957_v25  ;;  %461 = vmatpush.bf16.msra.mxu3 %v966_v46  ;;  %v977_v46 = vld [vmem:[#allocation2 + $0x130] sm:$0xff] }
  0x2a   : > { %553 = vmatpush.bf16.msrb.mxu0 %v974_v6 }
  0x2b   : > { %284 = vmatpush.bf16.msra.mxu1 %v947_v12 }
  0x2c   : > { %375 = vmatpush.bf16.msra.mxu2 %v956_v36  ;;  %462 = vmatpush.bf16.msra.mxu3 %v965_v50 }
  0x2e   : > { %554 = vmatpush.bf16.msrb.mxu0 %v973_v8 }
  0x2f   : > { %778 = vmatmul.msk.bf16.gmra.mxu0 %vm180_vm0, %v168_v10  ;;  %285 = vmatpush.bf16.msra.mxu1 %v946_v13  ;;  %v972_v13 = vld [vmem:[#allocation2 + $0x100] sm:$0xff] }
  0x30   : > { %376 = vmatpush.bf16.msra.mxu2 %v955_v37  ;;  %463 = vmatpush.bf16.msra.mxu3 %v964_v54 }
  0x32   : > { %555 = vmatpush.bf16.msrb.mxu0 %v972_v13 }
  0x33   : > { %286 = vmatpush.bf16.msra.mxu1 %v945_v14 }
  0x34   : > { %377 = vmatpush.bf16.msra.mxu2 %v954_v38  ;;  %464 = vmatpush.bf16.msra.mxu3 %v963_v62 }
  0x36   : > { %556 = vmatpush.bf16.msrb.mxu0 %v971_v19 }
  0x38   : > { %378 = vmatpush.bf16.msra.mxu2 %v953_v39  ;;  %465 = vmatpush.bf16.msra.mxu3 %v962_v63 }
  0x3c   : > { %466 = vmatpush.bf16.msra.mxu3 %v961_v0  ;;  %v592_v0 = vld [vmem:[#allocation2 + $0x170] sm:$0x1] }
  0x3d   : > { %v593_v1 = vunpack.c.l.bf16 %v592_v0 }
  0x3f   : > { %v594_v3 = vperm.slane %v593_v1, 0 }
  0x9c   : > { %v196_v18 = vpop.f32.mrf.mxu0 }
  0x9d   : > { %v197_v22 = vadd.f32 %v196_v18, %v173_v20 }
  0x9f   : > { %v206_v26 = vmax.f32 %v197_v22, 0.0  ;;  %v408_v22 = vld [vmem:[#allocation2 + $0xe0] sm:$0x1] }
  0xa4   : > { %v198_v23 = vpop.f32.mrf.mxu0 }
  0xa5   : > { %v199_v24 = vadd.f32 %v198_v23, %v173_v20  ;;  %v409_v23 = vunpack.c.l.bf16 %v408_v22 }
  0xa7   : > { %v207_v27 = vmax.f32 %v199_v24, 0.0  ;;  %v984_v24 = vld [vmem:[#allocation2 + $0x168] sm:$0xff] }
  0xa8   : > { %643 = vmatpush.bf16.msrb.mxu1 %v984_v24  ;;  %997 = vmatpush.bf16.msrb.mxu2 %v984_v24 }
  0xa9   : > { %v210_v28 = vpack.c.bf16 %v207_v27, %v206_v26  ;;  %v983_v26 = vld [vmem:[#allocation2 + $0x160] sm:$0xff]  ;;  %v410_v27 = vperm.slane %v409_v23, 0 }
  0xab   : > { %287 = vmatmul.bf16.vlgmr.msra.gmra.mxu1 %v210_v28  ;;  %v982_v28 = vld [vmem:[#allocation2 + $0x158] sm:$0xff] }
  0xac   : > { %v201_v29 = vpop.f32.mrf.mxu0  ;;  %644 = vmatpush.bf16.msrb.mxu1 %v983_v26  ;;  %998 = vmatpush.bf16.msrb.mxu2 %v983_v26 }
  0xad   : > { %v202_v30 = vadd.f32 %v201_v29, %v173_v20 }
  0xaf   : > { %v208_v33 = vmax.f32 %v202_v30, 0.0 }
  0xb0   : > { %645 = vmatpush.bf16.msrb.mxu1 %v982_v28  ;;  %999 = vmatpush.bf16.msrb.mxu2 %v982_v28 }
  0xb4   : > { %v203_v31 = vpop.f32.mrf.mxu0 }
  0xb5   : > { %v204_v32 = vadd.f32 %v203_v31, %v173_v20  ;;  %v970_v20 = vld [vmem:[#allocation2 + $0xf0] sm:$0xff] }
  0xb6   : > { %557 = vmatpush.bf16.msrb.mxu0 %v970_v20 }
  0xb7   : > { %v209_v34 = vmax.f32 %v204_v32, 0.0  ;;  %v981_v32 = vld [vmem:[#allocation2 + $0x150] sm:$0xff] }
  0xb8   : > { %646 = vmatpush.bf16.msrb.mxu1 %v981_v32  ;;  %1000 = vmatpush.bf16.msrb.mxu2 %v981_v32 }
  0xb9   : > { %v211_v35 = vpack.c.bf16 %v209_v34, %v208_v33 }
  0xba   : > { %558 = vmatpush.bf16.msrb.mxu0 %v969_v21 }
  0xbb   : > { %292 = vmatmul.bf16.gmra.mxu1 %v211_v35 }
 0x128   : > { %v288_v43 = vpop.f32.mrf.mxu1 }
 0x129   : > { %v289_v47 = vadd.f32 %v288_v43, %v230_v45  ;;  %v980_v43 = vld [vmem:[#allocation2 + $0x148] sm:$0xff] }
 0x12a   : > { %647 = vmatpush.bf16.msrb.mxu1 %v980_v43  ;;  %1001 = vmatpush.bf16.msrb.mxu2 %v980_v43 }
 0x12b   : > { %v298_v51 = vmax.f32 %v289_v47, 0.0  ;;  %v500_v47 = vld [vmem:[#allocation2 + $0x128] sm:$0x1] }
 0x12e   : > { %648 = vmatpush.bf16.msrb.mxu1 %v979_v44  ;;  %1002 = vmatpush.bf16.msrb.mxu2 %v979_v44 }
 0x130   : > { %v290_v48 = vpop.f32.mrf.mxu1 }
 0x131   : > { %v291_v49 = vadd.f32 %v290_v48, %v230_v45  ;;  %v501_v48 = vunpack.c.l.bf16 %v500_v47 }
 0x133   : > { %v299_v52 = vmax.f32 %v291_v49, 0.0  ;;  %v502_v50 = vperm.slane %v501_v48, 0 }
 0x135   : > { %v302_v53 = vpack.c.bf16 %v299_v52, %v298_v51 }
 0x137   : > { %379 = vmatmul.bf16.vlgmr.msra.gmra.mxu2 %v302_v53 }
 0x138   : > { %v293_v55 = vpop.f32.mrf.mxu1 }
 0x139   : > { %v294_v56 = vadd.f32 %v293_v55, %v230_v45 }
 0x13b   : > { %v300_v59 = vmax.f32 %v294_v56, 0.0 }
 0x140   : > { %v295_v57 = vpop.f32.mrf.mxu1 }
 0x141   : > { %v296_v58 = vadd.f32 %v295_v57, %v230_v45  ;;  %v978_v45 = vld [vmem:[#allocation2 + $0x138] sm:$0xff] }
 0x142   : > { %649 = vmatpush.bf16.msrb.mxu1 %v978_v45  ;;  %1003 = vmatpush.bf16.msrb.mxu2 %v978_v45 }
 0x143   : > { %v301_v60 = vmax.f32 %v296_v58, 0.0 }
 0x145   : > { %v303_v61 = vpack.c.bf16 %v301_v60, %v300_v59 }
 0x146   : > { %650 = vmatpush.bf16.msrb.mxu1 %v977_v46  ;;  %1004 = vmatpush.bf16.msrb.mxu2 %v977_v46 }
 0x147   : > { %384 = vmatmul.bf16.gmra.mxu2 %v303_v61 }
 0x1ba   : > { %v380_v4 = vpop.f32.mrf.mxu2 }
 0x1bb   : > { %v1239_v10 = vadd.f32 %v380_v4, %v322_v7 }
 0x1c2   : > { %v382_v9 = vpop.f32.mrf.mxu2 }
 0x1c3   : > { %v1241_v11 = vadd.f32 %v382_v9, %v322_v7 }
 0x1c5   : > { %v390_v12 = vpack.c.bf16 %v1241_v11, %v1239_v10 }
 0x1c7   : > { %467 = vmatmul.bf16.vlgmr.msra.gmra.mxu3 %v390_v12 }
 0x1ca   : > { %v385_v14 = vpop.f32.mrf.mxu2 }
 0x1cb   : > { %v1245_v16 = vadd.f32 %v385_v14, %v322_v7 }
 0x1d2   : > { %v387_v15 = vpop.f32.mrf.mxu2 }
 0x1d3   : > { %v1247_v17 = vadd.f32 %v387_v15, %v322_v7 }
 0x1d5   : > { %v391_v18 = vpack.c.bf16 %v1247_v17, %v1245_v16 }
 0x1d7   : > { %472 = vmatmul.bf16.gmra.mxu3 %v391_v18 }
 0x24a   : > { %v468_v25 = vpop.f32.mrf.mxu3 }
 0x24b   : > { %v469_v29 = vadd.f32 %v468_v25, %v410_v27 }
 0x24d   : > { %v478_v33 = vmax.f32 %v469_v29, 0.0 }
 0x252   : > { %v470_v30 = vpop.f32.mrf.mxu3 }
 0x253   : > { %v471_v31 = vadd.f32 %v470_v30, %v410_v27 }
 0x255   : > { %v479_v34 = vmax.f32 %v471_v31, 0.0 }
 0x257   : > { %v482_v35 = vpack.c.bf16 %v479_v34, %v478_v33 }
 0x259   : > { %559 = vmatmul.bf16.vlgmr.msrb.gmra.mxu0 %v482_v35 }
 0x25a   : > { %v473_v36 = vpop.f32.mrf.mxu3 }
 0x25b   : > { %v474_v37 = vadd.f32 %v473_v36, %v410_v27 }
 0x25d   : > { %v480_v40 = vmax.f32 %v474_v37, 0.0 }
 0x262   : > { %v475_v38 = vpop.f32.mrf.mxu3 }
 0x263   : > { %v476_v39 = vadd.f32 %v475_v38, %v410_v27 }
 0x265   : > { %v481_v41 = vmax.f32 %v476_v39, 0.0 }
 0x267   : > { %v483_v42 = vpack.c.bf16 %v481_v41, %v480_v40 }
 0x269   : > { %564 = vmatmul.bf16.gmra.mxu0 %v483_v42 }
 0x2d6   : > { %v560_v49 = vpop.f32.mrf.mxu0 }
 0x2d7   : > { %v561_v51 = vadd.f32 %v560_v49, %v502_v50 }
 0x2d9   : > { %v570_v54 = vmax.f32 %v561_v51, 0.0 }
 0x2de   : > { %v562_v52 = vpop.f32.mrf.mxu0 }
 0x2df   : > { %v563_v53 = vadd.f32 %v562_v52, %v502_v50 }
 0x2e1   : > { %v571_v55 = vmax.f32 %v563_v53, 0.0 }
 0x2e3   : > { %v574_v56 = vpack.c.bf16 %v571_v55, %v570_v54 }
 0x2e5   : > { %651 = vmatmul.bf16.vlgmr.msrb.gmra.mxu1 %v574_v56 }
 0x2e6   : > { %v565_v57 = vpop.f32.mrf.mxu0 }
 0x2e7   : > { %v566_v58 = vadd.f32 %v565_v57, %v502_v50 }
 0x2e9   : > { %v572_v61 = vmax.f32 %v566_v58, 0.0 }
 0x2ee   : > { %v567_v59 = vpop.f32.mrf.mxu0 }
 0x2ef   : > { %v568_v60 = vadd.f32 %v567_v59, %v502_v50 }
 0x2f1   : > { %v573_v62 = vmax.f32 %v568_v60, 0.0 }
 0x2f3   : > { %v575_v63 = vpack.c.bf16 %v573_v62, %v572_v61 }
 0x2f5   : > { %656 = vmatmul.bf16.vlgmr.msrb.gmra.mxu2 %v575_v63 }
 0x362   : > { %v652_v2 = vpop.f32.mrf.mxu1 }
 0x363   : > { %v653_v4 = vadd.f32 %v652_v2, %v594_v3 }
 0x365   : > { %v662_v7 = vadd.f32 %v653_v4, %v1239_v10 }
 0x36a   : > { %v654_v5 = vpop.f32.mrf.mxu1 }
 0x36b   : > { %v655_v6 = vadd.f32 %v654_v5, %v594_v3 }
 0x36d   : > { %v663_v8 = vadd.f32 %v655_v6, %v1241_v11 }
 0x36f   : > { %v989_v9 = vpack.c.bf16 %v663_v8, %v662_v7 }
 0x371   : > { %990 = vst [vmem:[%s154_s7] sm:$0xff] %v989_v9  }
 0x378   : > { %v657_v12 = vpop.f32.mrf.mxu2 }
 0x379   : > { %v658_v13 = vadd.f32 %v657_v12, %v594_v3 }
 0x37b   : > { %v664_v18 = vadd.f32 %v658_v13, %v1245_v16 }
 0x380   : > { %v659_v14 = vpop.f32.mrf.mxu2 }
 0x381   : > { %v660_v15 = vadd.f32 %v659_v14, %v594_v3 }
 0x383   : > { %v665_v10 = vadd.f32 %v660_v15, %v1247_v17 }
 0x385   : > { %v994_v11 = vpack.c.bf16 %v665_v10, %v664_v18 }
 0x387   : > { %996 = vst [vmem:[%s154_s7 + $0x8] sm:$0xff] %v994_v11  }
 0x388   : > { %1116 = shalt.err (!%p1113_p8)
}
 0x389   : > { %s1160_s30 = smov 64   ;;  %s1161_s3 = smov 4  }
 0x38a   : > { %1009 = dma.vmem_to_hbm [thread:$0]  (%p1215_p5), %s688_s21, 256, %s690_s22, %s675_s23, %s1160_s30, %s1160_s30, %s1161_s3  }
 0x38b PF: > { %p1021_p9 = scmp.ge.s32.totalorder %s1155_s12, 2  ;;  %s704_s4 = sand.u32 1, %s1143_s9  }
 0x38c   : > { %s705_s5 = scalar_lea.sflag [#allocation4], %s704_s4 }
 0x38d   : > { %p1016_p10 = pnand %p1021_p9, %p1219_p6 }
 0x38f   : > { %p1017_p11 = pneg %p1016_p10 }
 0x391   : > { %1138 = dma.done.wait (%p1017_p11), %s705_s5, 256  }
 0x392   : > { %1140 = vsyncadd (%p1017_p11), %s705_s5, 4294967040  ;;  %p13_p12 = scmp.ge.s32.totalorder %s1202_s15, 4   ;;  %s1292_s9 = smov %s1147_s10 }
 0x393   : > { %s1293_s10 = smov %s1151_s11  ;;  %s1294_s11 = smov %s1213_s18 }
 0x394   : > { %s1295_s12 = smov %s1202_s15  ;;  %15 = sbr.rel (!%p13_p12) target bundleno = 4 (0x4), region = 68 }
 0x399   :  { %711 = vsyncpa [#allocation3], 1 }
 0x39a   :  { %713 = vsyncpa [#allocation3 + $0x1], 1 }
 0x39b   :  { %714 = vsyncpa [#allocation4], 1 }
 0x39c   :  { %716 = vsyncpa [#allocation4 + $0x1], 1 }

// kernel: tpu_custom_call.1
= control target key start
LH: loop header
LB: loop body
LE: loop exit
PB: predicated region body
PF: predicated region fallthrough
CT: control target
= control target key end

     0   :  { %7 = vsyncpa [#allocation3], 0  ;;  %s1287_s0 = inlined_call_operand.vmem [shape: f32[64,16], index: 0, kind: input, shape index: {}]   ;;  %s1288_s1 = inlined_call_operand.hbm [shape: bf16[752,128], index: 1, kind: input, shape index: {}]   ;;  %s1289_s2 = inlined_call_operand.hbm [shape: bf16[64,128], index: 2, kind: output, shape index: {}]  }
   0x1   :  { %8 = vsyncpa [#allocation4], 0 }
   0x2   :  { %10 = vsyncpa [#allocation4 + $0x1], 0  ;;  %s1177_s9 = smov 0   ;;  %s1179_s10 = smov 0  }
   0x3   :  { %s1181_s11 = smov 0   ;;  %s1183_s12 = smov 0  }
   0x4 LB: > { %s1198_s13 = sadd.s32 4294967295, %s1155_s12   ;;  %s764_s14 = sadd.s32 4294967294, %s1155_s12   ;;  %s1155_s12 = sphi %s1183_s12, %s1295_s12   ;;  %s1151_s11 = sphi %s1181_s11, %s1294_s11   ;;  %s1147_s10 = sphi %s1179_s10, %s1293_s10   ;;  %s1143_s9 = sphi %s1177_s9, %s1292_s9  }
   0x5   : > { %s1202_s15 = sadd.s32 1, %s1155_s12   ;;  %s70_s16 = sadd.s32 1, %s1151_s11 }
   0x6   : > { %s67_s17 = ssub.s32 %s1155_s12, %s1202_s15  ;;  %p80_p0 = scmp.ne.s32.totalorder %s1151_s11, %s1147_s10 }
   0x7   : > { %p68_p1 = scmp.eq.s32.totalorder %s67_s17, 0  ;;  %p81_p2 = scmp.eq.s32.totalorder %s1198_s13, 1 }
   0x8   : > { %p86_p3 = scmp.ne.s32.totalorder %s1147_s10, %s1143_s9  ;;  %p87_p4 = scmp.eq.s32.totalorder %s764_s14, 1 }
   0x9   : > { %s1213_s18 = scalar_select %p68_p1, %s1151_s11, %s70_s16  }
   0xa   : > { %p1215_p5 = por %p81_p2, %p80_p0  ;;  %p1219_p6 = por %p87_p4, %p86_p3 }
   0xb   : > { %p765_p7 = scmp.ge.s32.totalorder %s1155_s12, 1  ;;  %p94_p8 = scmp.lt.s32.totalorder %s1155_s12, 3 }
   0xc   : > { %p1019_p9 = scmp.eq.s32.totalorder %s1198_s13, 0  ;;  %s105_s23 = sshll.u32 %s1288_s1, 4  ;;  %s106_s23 = int_to_ptr.hbm [resolvable:$true] %s105_s23 }
   0xd   : > { %p95_p10 = pnand %p765_p7, %p94_p8  ;;  %s1157_s24 = smov [#allocation2]  }
   0xe   : > { %s107_s25 = sshll.u32 %s1157_s24, 4  ;;  %s1158_s26 = smov 64   ;;  %s108_s25 = int_to_ptr.vmem [resolvable:$true] %s107_s25 }
   0xf   : > { %p1011_p11 = pneg %p95_p10  ;;  %s1159_s27 = smov 4  }
  0x10   : > { %132 = sbr.rel (%p95_p10) target bundleno = 907 (0x38b), region = 28 }
  0x11   : > { %p1012_p12 = pnand %p1019_p9, %p1011_p11 }
  0x13   : > { %1014 = dma.hbm_to_vmem [thread:$0]  (!%p1012_p12), %s106_s23, 6016, %s108_s25, [#allocation3], %s1158_s26, %s1158_s26, %s1159_s27  }
  0x15   : > { %1134 = dma.done.wait (%p1019_p9), [#allocation3], 6016  }
  0x16   : > { %1136 = vsyncadd (%p1019_p9), [#allocation3], 4294961280  ;;  %s771_s28 = sshll.u32 %s1198_s13, 2  ;;  %v944_v0 = vld [vmem:[#allocation2] sm:$0xff]  ;;  %v952_v4 = vld [vmem:[#allocation2 + $0x48] sm:$0xff]  ;;  %vm180_vm0 = vcmask 130048  }
  0x17   : > { %p156_p13 = scmp.lt.s32.totalorder %s771_s28, 7  ;;  %194 = vmatpush.bf16.msra.mxu0 %v944_v0  ;;  %279 = vmatpush.bf16.msra.mxu1 %v952_v4  ;;  %v951_v5 = vld [vmem:[#allocation2 + $0x40] sm:$0xff]  ;;  %v950_v6 = vld [vmem:[#allocation2 + $0x38] sm:$0xff]  ;;  %v949_v7 = vld [vmem:[#allocation2 + $0x30] sm:$0xff]  ;;  %s152_s5 = sand.u32 1, %s1147_s10  }
  0x18   : > { %v948_v11 = vld [vmem:[#allocation2 + $0x28] sm:$0xff]  ;;  %v947_v12 = vld [vmem:[#allocation2 + $0x20] sm:$0xff]  ;;  %v946_v13 = vld [vmem:[#allocation2 + $0x18] sm:$0xff]  ;;  %s770_s6 = sshll.u32 %s152_s5, 4  ;;  %s985_s8 = sshll.u32 %s1198_s13, 4 }
  0x19   : > { %s1297_s28 = smov (!%p156_p13, %s771_s28), 7  ;;  %v945_v14 = vld [vmem:[#allocation2 + $0x10] sm:$0xff]  ;;  %v171_v15 = vld [vmem:[#allocation2 + $0x8] sm:$0x1]  ;;  %v958_v21 = vld [vmem:[#allocation2 + $0x80] sm:$0xff]  ;;  %s154_s7 = scalar_lea.vmem [#allocation5], %s770_s6 }
  0x1a   : > { %s772_s29 = sshll.u32 %s1297_s28, 3  ;;  %v172_v16 = vunpack.c.l.bf16 %v171_v15  ;;  %v960_v17 = vld [vmem:[#allocation2 + $0x90] sm:$0xff]  ;;  %v959_v19 = vld [vmem:[#allocation2 + $0x88] sm:$0xff]  ;;  %v957_v25 = vld [vmem:[#allocation2 + $0x78] sm:$0xff]  ;;  %s686_s17 = scalar_lea.hbm %s1289_s2, %s985_s8 }
  0x1b   : > { %s159_s4 = scalar_lea.vmem %s1287_s0, %s772_s29  ;;  %280 = vmatpush.bf16.msra.mxu1 %v951_v5  ;;  %371 = vmatpush.bf16.msra.mxu2 %v960_v17  ;;  %v956_v36 = vld [vmem:[#allocation2 + $0x70] sm:$0xff]  ;;  %v955_v37 = vld [vmem:[#allocation2 + $0x68] sm:$0xff]  ;;  %v954_v38 = vld [vmem:[#allocation2 + $0x60] sm:$0xff]  ;;  %s687_s21 = sshll.u32 %s154_s7, 4  ;;  %s688_s21 = int_to_ptr.vmem [resolvable:$true] %s687_s21 }
  0x1c   : > { %v163_v1 = vld [vmem:[%s159_s4] sm:$0xff]  ;;  %v164_v2 = vld [vmem:[%s159_s4 + $0x8] sm:$0xff]  ;;  %v165_v8 = vld [vmem:[%s159_s4 + $0x10] sm:$0xff]  ;;  %v173_v20 = vperm.slane %v172_v16, 0  ;;  %s689_s22 = sshll.u32 %s686_s17, 4  ;;  %s675_s23 = scalar_lea.sflag [#allocation4], %s152_s5  ;;  %s690_s22 = int_to_ptr.hbm [resolvable:$true] %s689_s22 }
  0x1d   : > { %v167_v3 = vpack.c.bf16 %v164_v2, %v163_v1  ;;  %v166_v9 = vld [vmem:[%s159_s4 + $0x18] sm:$0xff]  ;;  %v228_v40 = vld [vmem:[#allocation2 + $0x50] sm:$0x1]  ;;  %v966_v46 = vld [vmem:[#allocation2 + $0xc8] sm:$0xff]  ;;  %s1103_s13 = sshra.s32 %s690_s22, 4  ;;  %s1109_s27 = scalar_lea.hbm %s1289_s2, 32  ;;  %s1104_s13 = int_to_ptr.hbm [resolvable:$true] %s1103_s13 }
  0x1e   : > { %v168_v10 = vpack.c.bf16 %v166_v9, %v165_v8  ;;  %v953_v39 = vld [vmem:[#allocation2 + $0x58] sm:$0xff]  ;;  %v229_v41 = vunpack.c.l.bf16 %v228_v40  ;;  %v967_v44 = vld [vmem:[#allocation2 + $0xd0] sm:$0xff]  ;;  %v965_v50 = vld [vmem:[#allocation2 + $0xc0] sm:$0xff]  ;;  %s1105_s24 = scalar_lea.hbm %s1104_s13, 16  ;;  %p1110_p3 = scmp.lt.s32.totalorder %s1104_s13, %s1289_s2 }
  0x1f   : > { %777 = vmatmul.msk.bf16.vlgmr.msra.gmra.mxu0 %vm180_vm0, %v167_v3  ;;  %281 = vmatpush.bf16.msra.mxu1 %v950_v6  ;;  %v968_v42 = vld [vmem:[#allocation2 + $0xd8] sm:$0xff]  ;;  %v963_v62 = vld [vmem:[#allocation2 + $0xb0] sm:$0xff]  ;;  %v962_v63 = vld [vmem:[#allocation2 + $0xa8] sm:$0xff]  ;;  %p1106_p0 = scmp.ne.s32.totalorder %s1104_s13, %s1105_s24  ;;  %p1111_p4 = scmp.lt.s32.totalorder %s1109_s27, %s1105_s24 }
  0x20   : > { %372 = vmatpush.bf16.msra.mxu2 %v959_v19  ;;  %459 = vmatpush.bf16.msra.mxu3 %v968_v42  ;;  %v230_v45 = vperm.slane %v229_v41, 0  ;;  %v964_v54 = vld [vmem:[#allocation2 + $0xb8] sm:$0xff]  ;;  %v961_v0 = vld [vmem:[#allocation2 + $0xa0] sm:$0xff]  ;;  %v974_v6 = vld [vmem:[#allocation2 + $0x110] sm:$0xff] }
  0x21   : > { %v976_v1 = vld [vmem:[#allocation2 + $0x120] sm:$0xff]  ;;  %v320_v2 = vld [vmem:[#allocation2 + $0x98] sm:$0x1]  ;;  %v973_v8 = vld [vmem:[#allocation2 + $0x108] sm:$0xff]  ;;  %p1107_p1 = pnand %p1106_p0, %p1215_p5  ;;  %p1112_p7 = por %p1111_p4, %p1110_p3 }
  0x22   : > { %551 = vmatpush.bf16.msrb.mxu0 %v976_v1  ;;  %v975_v3 = vld [vmem:[#allocation2 + $0x118] sm:$0xff]  ;;  %v321_v5 = vunpack.c.l.bf16 %v320_v2 }
  0x23   : > { %282 = vmatpush.bf16.msra.mxu1 %v949_v7  ;;  %v971_v19 = vld [vmem:[#allocation2 + $0xf8] sm:$0xff]  ;;  %p1108_p2 = pneg %p1107_p1 }
  0x24   : > { %373 = vmatpush.bf16.msra.mxu2 %v958_v21  ;;  %460 = vmatpush.bf16.msra.mxu3 %v967_v44  ;;  %v322_v7 = vperm.slane %v321_v5, 0  ;;  %v969_v21 = vld [vmem:[#allocation2 + $0xe8] sm:$0xff]  ;;  %v979_v44 = vld [vmem:[#allocation2 + $0x140] sm:$0xff] }
  0x25   : > { %p1113_p8 = pnand %p1112_p7, %p1108_p2 }
  0x26   : > { %552 = vmatpush.bf16.msrb.mxu0 %v975_v3 }
  0x27   : > { %283 = vmatpush.bf16.msra.mxu1 %v948_v11 }
  0x28   : > { %374 = vmatpush.bf16.msra.mxu2 %v957_v25  ;;  %461 = vmatpush.bf16.msra.mxu3 %v966_v46  ;;  %v977_v46 = vld [vmem:[#allocation2 + $0x130] sm:$0xff] }
  0x2a   : > { %553 = vmatpush.bf16.msrb.mxu0 %v974_v6 }
  0x2b   : > { %284 = vmatpush.bf16.msra.mxu1 %v947_v12 }
  0x2c   : > { %375 = vmatpush.bf16.msra.mxu2 %v956_v36  ;;  %462 = vmatpush.bf16.msra.mxu3 %v965_v50 }
  0x2e   : > { %554 = vmatpush.bf16.msrb.mxu0 %v973_v8 }
  0x2f   : > { %778 = vmatmul.msk.bf16.gmra.mxu0 %vm180_vm0, %v168_v10  ;;  %285 = vmatpush.bf16.msra.mxu1 %v946_v13  ;;  %v972_v13 = vld [vmem:[#allocation2 + $0x100] sm:$0xff] }
  0x30   : > { %376 = vmatpush.bf16.msra.mxu2 %v955_v37  ;;  %463 = vmatpush.bf16.msra.mxu3 %v964_v54 }
  0x32   : > { %555 = vmatpush.bf16.msrb.mxu0 %v972_v13 }
  0x33   : > { %286 = vmatpush.bf16.msra.mxu1 %v945_v14 }
  0x34   : > { %377 = vmatpush.bf16.msra.mxu2 %v954_v38  ;;  %464 = vmatpush.bf16.msra.mxu3 %v963_v62 }
  0x36   : > { %556 = vmatpush.bf16.msrb.mxu0 %v971_v19 }
  0x38   : > { %378 = vmatpush.bf16.msra.mxu2 %v953_v39  ;;  %465 = vmatpush.bf16.msra.mxu3 %v962_v63 }
  0x3c   : > { %466 = vmatpush.bf16.msra.mxu3 %v961_v0  ;;  %v592_v0 = vld [vmem:[#allocation2 + $0x170] sm:$0x1] }
  0x3d   : > { %v593_v1 = vunpack.c.l.bf16 %v592_v0 }
  0x3f   : > { %v594_v3 = vperm.slane %v593_v1, 0 }
  0x9c   : > { %v196_v18 = vpop.f32.mrf.mxu0 }
  0x9d   : > { %v197_v22 = vadd.f32 %v196_v18, %v173_v20 }
  0x9f   : > { %v206_v26 = vmax.f32 %v197_v22, 0.0  ;;  %v408_v22 = vld [vmem:[#allocation2 + $0xe0] sm:$0x1] }
  0xa4   : > { %v198_v23 = vpop.f32.mrf.mxu0 }
  0xa5   : > { %v199_v24 = vadd.f32 %v198_v23, %v173_v20  ;;  %v409_v23 = vunpack.c.l.bf16 %v408_v22 }
  0xa7   : > { %v207_v27 = vmax.f32 %v199_v24, 0.0  ;;  %v984_v24 = vld [vmem:[#allocation2 + $0x168] sm:$0xff] }
  0xa8   : > { %643 = vmatpush.bf16.msrb.mxu1 %v984_v24  ;;  %997 = vmatpush.bf16.msrb.mxu2 %v984_v24 }
  0xa9   : > { %v210_v28 = vpack.c.bf16 %v207_v27, %v206_v26  ;;  %v983_v26 = vld [vmem:[#allocation2 + $0x160] sm:$0xff]  ;;  %v410_v27 = vperm.slane %v409_v23, 0 }
  0xab   : > { %287 = vmatmul.bf16.vlgmr.msra.gmra.mxu1 %v210_v28  ;;  %v982_v28 = vld [vmem:[#allocation2 + $0x158] sm:$0xff] }
  0xac   : > { %v201_v29 = vpop.f32.mrf.mxu0  ;;  %644 = vmatpush.bf16.msrb.mxu1 %v983_v26  ;;  %998 = vmatpush.bf16.msrb.mxu2 %v983_v26 }
  0xad   : > { %v202_v30 = vadd.f32 %v201_v29, %v173_v20 }
  0xaf   : > { %v208_v33 = vmax.f32 %v202_v30, 0.0 }
  0xb0   : > { %645 = vmatpush.bf16.msrb.mxu1 %v982_v28  ;;  %999 = vmatpush.bf16.msrb.mxu2 %v982_v28 }
  0xb4   : > { %v203_v31 = vpop.f32.mrf.mxu0 }
  0xb5   : > { %v204_v32 = vadd.f32 %v203_v31, %v173_v20  ;;  %v970_v20 = vld [vmem:[#allocation2 + $0xf0] sm:$0xff] }
  0xb6   : > { %557 = vmatpush.bf16.msrb.mxu0 %v970_v20 }
  0xb7   : > { %v209_v34 = vmax.f32 %v204_v32, 0.0  ;;  %v981_v32 = vld [vmem:[#allocation2 + $0x150] sm:$0xff] }
  0xb8   : > { %646 = vmatpush.bf16.msrb.mxu1 %v981_v32  ;;  %1000 = vmatpush.bf16.msrb.mxu2 %v981_v32 }
  0xb9   : > { %v211_v35 = vpack.c.bf16 %v209_v34, %v208_v33 }
  0xba   : > { %558 = vmatpush.bf16.msrb.mxu0 %v969_v21 }
  0xbb   : > { %292 = vmatmul.bf16.gmra.mxu1 %v211_v35 }
 0x128   : > { %v288_v43 = vpop.f32.mrf.mxu1 }
 0x129   : > { %v289_v47 = vadd.f32 %v288_v43, %v230_v45  ;;  %v980_v43 = vld [vmem:[#allocation2 + $0x148] sm:$0xff] }
 0x12a   : > { %647 = vmatpush.bf16.msrb.mxu1 %v980_v43  ;;  %1001 = vmatpush.bf16.msrb.mxu2 %v980_v43 }
 0x12b   : > { %v298_v51 = vmax.f32 %v289_v47, 0.0  ;;  %v500_v47 = vld [vmem:[#allocation2 + $0x128] sm:$0x1] }
 0x12e   : > { %648 = vmatpush.bf16.msrb.mxu1 %v979_v44  ;;  %1002 = vmatpush.bf16.msrb.mxu2 %v979_v44 }
 0x130   : > { %v290_v48 = vpop.f32.mrf.mxu1 }
 0x131   : > { %v291_v49 = vadd.f32 %v290_v48, %v230_v45  ;;  %v501_v48 = vunpack.c.l.bf16 %v500_v47 }
 0x133   : > { %v299_v52 = vmax.f32 %v291_v49, 0.0  ;;  %v502_v50 = vperm.slane %v501_v48, 0 }
 0x135   : > { %v302_v53 = vpack.c.bf16 %v299_v52, %v298_v51 }
 0x137   : > { %379 = vmatmul.bf16.vlgmr.msra.gmra.mxu2 %v302_v53 }
 0x138   : > { %v293_v55 = vpop.f32.mrf.mxu1 }
 0x139   : > { %v294_v56 = vadd.f32 %v293_v55, %v230_v45 }
 0x13b   : > { %v300_v59 = vmax.f32 %v294_v56, 0.0 }
 0x140   : > { %v295_v57 = vpop.f32.mrf.mxu1 }
 0x141   : > { %v296_v58 = vadd.f32 %v295_v57, %v230_v45  ;;  %v978_v45 = vld [vmem:[#allocation2 + $0x138] sm:$0xff] }
 0x142   : > { %649 = vmatpush.bf16.msrb.mxu1 %v978_v45  ;;  %1003 = vmatpush.bf16.msrb.mxu2 %v978_v45 }
 0x143   : > { %v301_v60 = vmax.f32 %v296_v58, 0.0 }
 0x145   : > { %v303_v61 = vpack.c.bf16 %v301_v60, %v300_v59 }
 0x146   : > { %650 = vmatpush.bf16.msrb.mxu1 %v977_v46  ;;  %1004 = vmatpush.bf16.msrb.mxu2 %v977_v46 }
 0x147   : > { %384 = vmatmul.bf16.gmra.mxu2 %v303_v61 }
 0x1ba   : > { %v380_v4 = vpop.f32.mrf.mxu2 }
 0x1bb   : > { %v1239_v10 = vadd.f32 %v380_v4, %v322_v7 }
 0x1c2   : > { %v382_v9 = vpop.f32.mrf.mxu2 }
 0x1c3   : > { %v1241_v11 = vadd.f32 %v382_v9, %v322_v7 }
 0x1c5   : > { %v390_v12 = vpack.c.bf16 %v1241_v11, %v1239_v10 }
 0x1c7   : > { %467 = vmatmul.bf16.vlgmr.msra.gmra.mxu3 %v390_v12 }
 0x1ca   : > { %v385_v14 = vpop.f32.mrf.mxu2 }
 0x1cb   : > { %v1245_v16 = vadd.f32 %v385_v14, %v322_v7 }
 0x1d2   : > { %v387_v15 = vpop.f32.mrf.mxu2 }
 0x1d3   : > { %v1247_v17 = vadd.f32 %v387_v15, %v322_v7 }
 0x1d5   : > { %v391_v18 = vpack.c.bf16 %v1247_v17, %v1245_v16 }
 0x1d7   : > { %472 = vmatmul.bf16.gmra.mxu3 %v391_v18 }
 0x24a   : > { %v468_v25 = vpop.f32.mrf.mxu3 }
 0x24b   : > { %v469_v29 = vadd.f32 %v468_v25, %v410_v27 }
 0x24d   : > { %v478_v33 = vmax.f32 %v469_v29, 0.0 }
 0x252   : > { %v470_v30 = vpop.f32.mrf.mxu3 }
 0x253   : > { %v471_v31 = vadd.f32 %v470_v30, %v410_v27 }
 0x255   : > { %v479_v34 = vmax.f32 %v471_v31, 0.0 }
 0x257   : > { %v482_v35 = vpack.c.bf16 %v479_v34, %v478_v33 }
 0x259   : > { %559 = vmatmul.bf16.vlgmr.msrb.gmra.mxu0 %v482_v35 }
 0x25a   : > { %v473_v36 = vpop.f32.mrf.mxu3 }
 0x25b   : > { %v474_v37 = vadd.f32 %v473_v36, %v410_v27 }
 0x25d   : > { %v480_v40 = vmax.f32 %v474_v37, 0.0 }
 0x262   : > { %v475_v38 = vpop.f32.mrf.mxu3 }
 0x263   : > { %v476_v39 = vadd.f32 %v475_v38, %v410_v27 }
 0x265   : > { %v481_v41 = vmax.f32 %v476_v39, 0.0 }
 0x267   : > { %v483_v42 = vpack.c.bf16 %v481_v41, %v480_v40 }
 0x269   : > { %564 = vmatmul.bf16.gmra.mxu0 %v483_v42 }
 0x2d6   : > { %v560_v49 = vpop.f32.mrf.mxu0 }
 0x2d7   : > { %v561_v51 = vadd.f32 %v560_v49, %v502_v50 }
 0x2d9   : > { %v570_v54 = vmax.f32 %v561_v51, 0.0 }
 0x2de   : > { %v562_v52 = vpop.f32.mrf.mxu0 }
 0x2df   : > { %v563_v53 = vadd.f32 %v562_v52, %v502_v50 }
 0x2e1   : > { %v571_v55 = vmax.f32 %v563_v53, 0.0 }
 0x2e3   : > { %v574_v56 = vpack.c.bf16 %v571_v55, %v570_v54 }
 0x2e5   : > { %651 = vmatmul.bf16.vlgmr.msrb.gmra.mxu1 %v574_v56 }
 0x2e6   : > { %v565_v57 = vpop.f32.mrf.mxu0 }
 0x2e7   : > { %v566_v58 = vadd.f32 %v565_v57, %v502_v50 }
 0x2e9   : > { %v572_v61 = vmax.f32 %v566_v58, 0.0 }
 0x2ee   : > { %v567_v59 = vpop.f32.mrf.mxu0 }
 0x2ef   : > { %v568_v60 = vadd.f32 %v567_v59, %v502_v50 }
 0x2f1   : > { %v573_v62 = vmax.f32 %v568_v60, 0.0 }
 0x2f3   : > { %v575_v63 = vpack.c.bf16 %v573_v62, %v572_v61 }
 0x2f5   : > { %656 = vmatmul.bf16.vlgmr.msrb.gmra.mxu2 %v575_v63 }
 0x362   : > { %v652_v2 = vpop.f32.mrf.mxu1 }
 0x363   : > { %v653_v4 = vadd.f32 %v652_v2, %v594_v3 }
 0x365   : > { %v662_v7 = vadd.f32 %v653_v4, %v1239_v10 }
 0x36a   : > { %v654_v5 = vpop.f32.mrf.mxu1 }
 0x36b   : > { %v655_v6 = vadd.f32 %v654_v5, %v594_v3 }
 0x36d   : > { %v663_v8 = vadd.f32 %v655_v6, %v1241_v11 }
 0x36f   : > { %v989_v9 = vpack.c.bf16 %v663_v8, %v662_v7 }
 0x371   : > { %990 = vst [vmem:[%s154_s7] sm:$0xff] %v989_v9  }
 0x378   : > { %v657_v12 = vpop.f32.mrf.mxu2 }
 0x379   : > { %v658_v13 = vadd.f32 %v657_v12, %v594_v3 }
 0x37b   : > { %v664_v18 = vadd.f32 %v658_v13, %v1245_v16 }
 0x380   : > { %v659_v14 = vpop.f32.mrf.mxu2 }
 0x381   : > { %v660_v15 = vadd.f32 %v659_v14, %v594_v3 }
 0x383   : > { %v665_v10 = vadd.f32 %v660_v15, %v1247_v17 }
 0x385   : > { %v994_v11 = vpack.c.bf16 %v665_v10, %v664_v18 }
 0x387   : > { %996 = vst [vmem:[%s154_s7 + $0x8] sm:$0xff] %v994_v11  }
 0x388   : > { %1116 = shalt.err (!%p1113_p8)
}
 0x389   : > { %s1160_s30 = smov 64   ;;  %s1161_s3 = smov 4  }
 0x38a   : > { %1009 = dma.vmem_to_hbm [thread:$0]  (%p1215_p5), %s688_s21, 256, %s690_s22, %s675_s23, %s1160_s30, %s1160_s30, %s1161_s3  }
 0x38b PF: > { %p1021_p9 = scmp.ge.s32.totalorder %s1155_s12, 2  ;;  %s704_s4 = sand.u32 1, %s1143_s9  }
 0x38c   : > { %s705_s5 = scalar_lea.sflag [#allocation4], %s704_s4 }
 0x38d   : > { %p1016_p10 = pnand %p1021_p9, %p1219_p6 }
 0x38f   : > { %p1017_p11 = pneg %p1016_p10 }
 0x391   : > { %1138 = dma.done.wait (%p1017_p11), %s705_s5, 256  }
 0x392   : > { %1140 = vsyncadd (%p1017_p11), %s705_s5, 4294967040  ;;  %p13_p12 = scmp.ge.s32.totalorder %s1202_s15, 4   ;;  %s1292_s9 = smov %s1147_s10 }
 0x393   : > { %s1293_s10 = smov %s1151_s11  ;;  %s1294_s11 = smov %s1213_s18 }
 0x394   : > { %s1295_s12 = smov %s1202_s15  ;;  %15 = sbr.rel (!%p13_p12) target bundleno = 4 (0x4), region = 68 }
 0x399   :  { %711 = vsyncpa [#allocation3], 1 }
 0x39a   :  { %713 = vsyncpa [#allocation3 + $0x1], 1 }
 0x39b   :  { %714 = vsyncpa [#allocation4], 1 }
 0x39c   :  { %716 = vsyncpa [#allocation4 + $0x1], 1 }

</bundles_post_ra>
